<compile_context>
chip_gen: v7x
topology: tpu7x:2x2x1
jax: 0.10.0
libtpu: 0.0.40
codegen_flags: <defaults>
</compile_context>

<pallas_src>
import functools

import jax
import jax.numpy as jnp
from jax import lax
from jax.experimental import pallas as pl
from jax.experimental.pallas import tpu as pltpu

# ---- "args" (deterministic config) ------------------------------------------------
THRESHOLD = 0.5          # args.threshold
TEMPERATURE = 0.1        # args.temperature
ALPHA = 1.0              # args.alpha
BETA = 1.0               # args.beta
ADDITIONAL_POSITION = False   # args.additional_position
EPS_LOG = 1e-4
NORM_EPS = 1e-12         # torch.nn.functional.normalize default eps
PATCH = 4                # stand-in patch size
FEATURE_DIM = 32         # args.vit_feature_size == args.slot_size
NUM_SLOTS = 8            # args.num_slots


# ---- chip-aware static config ------------------------------------------------------
def _device_kind():
    try:
        return jax.devices()[0].device_kind.lower()
    except Exception:
        return ""


def _bf16_eup_supported():
    kind = _device_kind()
    if "tpu" not in kind:
        return False
    # bf16 VPU/EUP exists on v6e and newer; v5e and older would only add casts.
    return not any(tag in kind for tag in ("v2", "v3", "v4", "v5"))


def _vmem_limit_bytes():
    kind = _device_kind()
    if any(tag in kind for tag in ("v5", "v6")):
        # 128 MiB physical VMEM; raise the 16/32 MiB scoped default.
        return 100 * 1024 * 1024
    # v7x has 64 MiB physical VMEM; stay conservative there and on unknown chips.
    return 48 * 1024 * 1024


def _pick_query_tile(n):
    # Constraint on the (BB, K, TQ) attn output block: TQ == N or TQ % 128 == 0.
    if n <= 512:
        return n
    for tq in (512, 384, 256, 128):
        if n % tq == 0:
            return tq
    # TODO(synk): pad N to a multiple of 128 for DINO grids where no 128-multiple divides N.
    return n


def _pick_tiles(b, n, d, k, vmem_budget):
    """Pick (batch_block, query_tile) so the per-step working set fits the VMEM budget
    and the grid has >= 2 batch blocks (megacore on v7x)."""
    tq = _pick_query_tile(n)
    cap = max(1, b // 2)
    bb = 1
    for cand in (8, 4, 2, 1):
        if cand <= cap and b % cand == 0:
            bb = cand
            break

    def est_bytes(bb_):
        inter = 4 * bb_ * tq * n * 4                       # ff, ff_corr, t2, log(t2) (f32)
        scr = bb_ * n * d * 2 + bb_ * k * n * 4            # fk bf16 + sf_corr f32 scratch
        dma = 2 * (bb_ * n * d * 4 + bb_ * k * d * 4 + bb_ * k * tq * 4)  # dbl-buffered I/O
        return inter + scr + dma

    while bb > 1 and est_bytes(bb) > 0.75 * vmem_budget:
        bb //= 2
    return bb, tq


# ---- in-kernel helpers --------------------------------------------------------------
def _l2norm(x):
    ss = jnp.sum(x * x, axis=-1, keepdims=True)
    return x * lax.rsqrt(jnp.maximum(ss, NORM_EPS * NORM_EPS))


def _softmax(x, axis, *, approx_recip=True, exp_bf16=False):
    m = jnp.max(x, axis=axis, keepdims=True)
    z = x - m
    if exp_bf16:
        # packed-bf16 exp halves the vreg traffic on the single EUP slot (v6e/v7x);
        # the row-sum / normalization stays f32.
        e = jnp.exp(z.astype(jnp.bfloat16)).astype(jnp.float32)
    else:
        e = jnp.exp(z)
    denom = jnp.sum(e, axis=axis, keepdims=True)
    if approx_recip:
        return e * pl.reciprocal(denom, approx=True)
    return e / denom


# ---- Pallas kernel: batched correlation + walk losses -------------------------------
def sacrw_kernel(feat_ref, slot_ref, attn_ref, loss_ref,
                 fk_scr, s_scr, sf_scr, diag_scr, *, tq, use_bf16_eup):
    q = pl.program_id(1)
    nq = pl.num_programs(1)
    n = feat_ref.shape[1]
    inv_t = 1.0 / TEMPERATURE

    # ---- per-batch-block preamble (q == 0): normalize + full sf_corr + zero accums --
    @pl.when(q == 0)
    def _init():
        fk = _l2norm(feat_ref[...].astype(jnp.float32))       # (BB, N, D)
        s = _l2norm(slot_ref[...].astype(jnp.float32))        # (BB, K, D)
        fk16 = fk.astype(jnp.bfloat16)
        s16 = s.astype(jnp.bfloat16)
        fk_scr[...] = fk16
        s_scr[...] = s16
        # slot-feature correlation, softmax over all N tokens ('NT' form, no transpose).
        sf = jnp.einsum("bkd,bnd->bkn", s16, fk16,
                        preferred_element_type=jnp.float32)   # (BB, K, N)
        # exact divide: computed once per block (tiny K x N) and feeds both log-losses.
        sf_scr[...] = _softmax(sf * inv_t, axis=-1, approx_recip=False)
        diag_scr[...] = jnp.zeros_like(diag_scr)
        loss_ref[...] = jnp.zeros_like(loss_ref)

    # ---- per-query-tile body ---------------------------------------------------------
    start = pl.multiple_of(q * tq, tq)
    if tq == n:               # static branch: no tiling along tokens
        fq16 = fk_scr[...]                                    # (BB, TQ, D) bf16
    else:
        fq16 = fk_scr[:, pl.ds(start, tq), :]
    s16 = s_scr[...]                                          # (BB, K, D)  bf16
    sf_corr = sf_scr[...]                                     # (BB, K, N)  f32

    # feature(query tile) -> slot correlation, softmax over the (sublane) K axis.
    sfq = jnp.einsum("bkd,bnd->bkn", s16, fq16,
                     preferred_element_type=jnp.float32)      # (BB, K, TQ)
    fsT_tile = _softmax(sfq * inv_t, axis=1, approx_recip=True)

    # feature-feature correlation of the query tile against all tokens.
    ff = jnp.einsum("bnd,bmd->bnm", fq16, fk_scr[...],
                    preferred_element_type=jnp.float32)       # (BB, TQ, N)
    ff_logits = jnp.where(ff >= THRESHOLD, ff, -10000.0) * inv_t
    ff_corr = _softmax(ff_logits, axis=-1, approx_recip=True, exp_bf16=use_bf16_eup)

    # feature -> slot -> feature walk: contract over K; Mosaic does the 8xTQ transpose.
    t2 = jnp.einsum("bkn,bkm->bnm",
                    fsT_tile.astype(jnp.bfloat16), sf_corr.astype(jnp.bfloat16),
                    preferred_element_type=jnp.float32)       # (BB, TQ, N)
    if use_bf16_eup:
        log_t2 = jnp.log((t2 + EPS_LOG).astype(jnp.bfloat16)).astype(jnp.float32)
    else:
        log_t2 = jnp.log(t2 + EPS_LOG)
    pwp_part = -jnp.sum(log_t2 * ff_corr)

    # slot -> feature -> slot walk: only the diagonal is needed; accumulate over tiles.
    if tq == n:
        sf_tile = sf_corr
    else:
        sf_tile = sf_scr[:, :, pl.ds(start, tq)]              # (BB, K, TQ)
    diag_scr[...] += jnp.sum(sf_tile * fsT_tile, axis=-1)     # (BB, K)

    # lane-dense (K, TQ) store of the slot-attention correlation tile.
    attn_ref[...] = fsT_tile.astype(attn_ref.dtype)

    # accumulate both per-block losses into the resident (1, 1, 2) output block.
    wpw_part = jnp.where(q == nq - 1,
                         -jnp.sum(jnp.log(diag_scr[...] + EPS_LOG)),
                         jnp.float32(0.0))
    lane = lax.broadcasted_iota(jnp.int32, (1, 1, 2), 2)
    loss_ref[...] += jnp.where(lane == 0, wpw_part, pwp_part)


def sacrw_core(features, slots, *, use_bf16_eup=None, vmem_limit=None):
    """features: (B, N, D) f32; slots: (B, K, D) f32.
    Returns fs_corr in transposed (B, K, N) layout plus the two walk losses."""
    B, N, D = features.shape
    K = slots.shape[1]
    if use_bf16_eup is None:
        use_bf16_eup = _bf16_eup_supported()
    if vmem_limit is None:
        vmem_limit = _vmem_limit_bytes()
    BB, TQ = _pick_tiles(B, N, D, K, vmem_limit)
    G = B // BB
    QT = N // TQ

    kernel = functools.partial(sacrw_kernel, tq=TQ, use_bf16_eup=use_bf16_eup)

    attn_corr, loss_parts = pl.pallas_call(
        kernel,
        out_shape=(
            jax.ShapeDtypeStruct((B, K, N), jnp.float32),
            jax.ShapeDtypeStruct((G, 1, 2), jnp.float32),     # [:, :, 0]=wpw, [:, :, 1]=pwp
        ),
        grid_spec=pltpu.PrefetchScalarGridSpec(
            num_scalar_prefetch=0,
            grid=(G, QT),
            in_specs=[
                # key-side features & slots stay resident across the whole TQ sweep
                pl.BlockSpec((BB, N, D), lambda g, q: (g, 0, 0)),
                pl.BlockSpec((BB, K, D), lambda g, q: (g, 0, 0)),
            ],
            out_specs=(
                pl.BlockSpec((BB, K, TQ), lambda g, q: (g, 0, q)),
                pl.BlockSpec((1, 1, 2), lambda g, q: (g, 0, 0)),   # resident loss accumulator
            ),
            scratch_shapes=[
                pltpu.VMEM((BB, N, D), jnp.bfloat16),   # normalized key features
                pltpu.VMEM((BB, K, D), jnp.bfloat16),   # normalized slots
                pltpu.VMEM((BB, K, N), jnp.float32),    # sf_corr (softmax over tokens)
                pltpu.VMEM((BB, K), jnp.float32),       # wpw diagonal accumulator
            ],
        ),
        compiler_params=pltpu.CompilerParams(
            dimension_semantics=("parallel", "arbitrary"),
            vmem_limit_bytes=vmem_limit,
        ),
    )(features, slots)

    wpw_loss = jnp.sum(loss_parts[:, :, 0]) / (B * K * K)   # mean over (B*K, K) with eye mask
    pwp_loss = jnp.sum(loss_parts[:, :, 1]) / (B * N * N)   # mean over (B*N, N)
    return attn_corr, wpw_loss, pwp_loss


# ---- Full forward (glue in plain JAX) ------------------------------------------------
def sacrw_forward(image, patch_embed_w, slots_param):
    B, C, H, W = image.shape
    He, We = H // PATCH, W // PATCH
    N = He * We

    # TODO(synk): frozen DINO ViT encoder (checkpoint load) replaced by a deterministic
    # linear patch-embedding stand-in producing (B, N, D) features.
    patches = image.reshape(B, C, He, PATCH, We, PATCH)
    patches = patches.transpose(0, 2, 4, 1, 3, 5).reshape(B, N, C * PATCH * PATCH)
    features = jnp.matmul(patches, patch_embed_w)                 # (B, N, D)

    # TODO(synk): SlotAttentionEncoder replaced by deterministic slot parameters.
    slots = jnp.broadcast_to(slots_param[None], (B,) + slots_param.shape)  # (B, K, D)

    # TODO(synk): additional_position branch (positionalencoding2d) disabled by config.

    attn_corr, wpw_loss, pwp_loss = sacrw_core(features, slots)

    K = slots_param.shape[0]
    # Kernel already emits (B, K, N): no post-kernel transpose needed.
    attns = attn_corr.reshape(B, K, He, We)
    attns = jax.image.resize(attns, (B, K, H, W), method="bilinear")  # align_corners=False
    attns = attns[:, :, None, :, :]                                   # (B, K, 1, H, W)

    loss = ALPHA * wpw_loss + BETA * pwp_loss
    log_dict = {"wpw_loss": ALPHA * wpw_loss, "pwp_loss": BETA * pwp_loss}
    return loss, attns, log_dict, features, slots


# ---- pure-JAX reference for the kernel math ------------------------------------------
def _l2norm_ref(x):
    n = jnp.sqrt(jnp.sum(x * x, axis=-1, keepdims=True))
    return x / jnp.maximum(n, NORM_EPS)


def sacrw_core_ref(features, slots):
    B, N, D = features.shape
    K = slots.shape[1]
    f = _l2norm_ref(features)
    s = _l2norm_ref(slots)
    ff = jnp.einsum("bnd,bmd->bnm", f, f)
    ff_corr = jax.nn.softmax(jnp.where(ff >= THRESHOLD, ff, -10000.0) / TEMPERATURE, -1)
    fs = jnp.einsum("bnd,bkd->bnk", f, s)
    fs_corr = jax.nn.softmax(fs / TEMPERATURE, -1)
    sf_corr = jax.nn.softmax(jnp.swapaxes(fs, 1, 2) / TEMPERATURE, -1)
    t1 = jnp.einsum("bkn,bnj->bkj", sf_corr, fs_corr)
    eye = jnp.eye(K)[None]
    wpw = jnp.mean(-jnp.log(t1 + EPS_LOG) * eye)
    t2 = jnp.einsum("bnk,bkm->bnm", fs_corr, sf_corr)
    pwp = jnp.mean(-jnp.log(t2 + EPS_LOG) * ff_corr)
    return fs_corr, wpw, pwp


if __name__ == "__main__":
    key = jax.random.PRNGKey(0)
    k_img, k_w, k_s = jax.random.split(key, 3)

    B, C, H, W = 2, 3, 32, 32
    image = jax.random.normal(k_img, (B, C, H, W), dtype=jnp.float32)
    patch_embed_w = (jax.random.normal(k_w, (C * PATCH * PATCH, FEATURE_DIM), jnp.float32)
                     * (1.0 / jnp.sqrt(C * PATCH * PATCH)))
    slots_param = jax.random.normal(k_s, (NUM_SLOTS, FEATURE_DIM), jnp.float32)

    loss, attns, log_dict, features, slots = jax.jit(sacrw_forward)(
        image, patch_embed_w, slots_param)
    jax.block_until_ready((loss, attns))

    # correctness check against pure-JAX reference (loose tol for bf16 MXU inputs)
    fs_ref, wpw_ref, pwp_ref = sacrw_core_ref(features, slots)
    loss_expected = ALPHA * wpw_ref + BETA * pwp_ref
    He, We = H // PATCH, W // PATCH
    attns_ref = jnp.swapaxes(fs_ref, 1, 2).reshape(B, NUM_SLOTS, He, We)
    attns_ref = jax.image.resize(attns_ref, (B, NUM_SLOTS, H, W),
                                 method="bilinear")[:, :, None, :, :]

    assert attns.shape == (B, NUM_SLOTS, 1, H, W)
    assert bool(jnp.isfinite(loss)), "loss is not finite"
    assert bool(jnp.all(jnp.isfinite(attns))), "attns not finite"
    assert jnp.allclose(loss, loss_expected, rtol=5e-2, atol=5e-2), (loss, loss_expected)
    assert jnp.allclose(log_dict["wpw_loss"], ALPHA * wpw_ref, rtol=5e-2, atol=5e-2)
    assert jnp.allclose(log_dict["pwp_loss"], BETA * pwp_ref, rtol=5e-2, atol=5e-2)
    assert jnp.allclose(attns, attns_ref, rtol=5e-2, atol=5e-2), float(
        jnp.max(jnp.abs(attns - attns_ref)))

    print("KERNEL_OK")
</pallas_src>

<mosaic_0001>
module attributes {stable_mosaic.version = 11 : i64} {
  func.func @sacrw_kernel(%arg0: i32, %arg1: i32, %arg2: memref<1x64x32xf32, #tpu.memory_space<vmem>>, %arg3: memref<1x8x32xf32, #tpu.memory_space<vmem>>, %arg4: memref<1x8x64xf32, #tpu.memory_space<vmem>>, %arg5: memref<1x1x2xf32, #tpu.memory_space<vmem>>, %arg6: memref<1x64x32xbf16, #tpu.memory_space<vmem>>, %arg7: memref<1x8x32xbf16, #tpu.memory_space<vmem>>, %arg8: memref<1x8x64xf32, #tpu.memory_space<vmem>>, %arg9: memref<1x8xf32, #tpu.memory_space<vmem>>) attributes {dimension_semantics = [#tpu.dimension_semantics<parallel>, #tpu.dimension_semantics<arbitrary>], iteration_bounds = array<i64: 2, 1>, scalar_prefetch = 0 : i64, scratch_operands = 4 : i64, tpu.core_type = #tpu.core_type<tc>, window_params = [{transform_indices = @transform_0, window_bounds = array<i64: 1, 64, 32>}, {transform_indices = @transform_1, window_bounds = array<i64: 1, 8, 32>}, {transform_indices = @transform_2, window_bounds = array<i64: 1, 8, 64>}, {transform_indices = @transform_3, window_bounds = array<i64: 1, 1, 2>}]} {
    %c0_i32 = arith.constant 0 : i32
    %0 = arith.cmpi eq, %arg1, %c0_i32 : i32
    %1 = arith.extui %0 : i1 to i32
    %c0_i32_0 = arith.constant 0 : i32
    %2 = arith.cmpi ne, %1, %c0_i32_0 : i32
    scf.if %2 {
      %c0_47 = arith.constant 0 : index
      %c0_48 = arith.constant 0 : index
      %c0_49 = arith.constant 0 : index
      %75 = vector.load %arg2[%c0_47, %c0_48, %c0_49] : memref<1x64x32xf32, #tpu.memory_space<vmem>>, vector<1x64x32xf32>
      %76 = arith.mulf %75, %75 : vector<1x64x32xf32>
      %cst_50 = arith.constant dense<0.000000e+00> : vector<1x64xf32>
      %77 = vector.multi_reduction <add>, %76, %cst_50 [2] : vector<1x64x32xf32> to vector<1x64xf32>
      %78 = vector.shape_cast %77 : vector<1x64xf32> to vector<1x64x1xf32>
      %cst_51 = arith.constant 1.000000e-24 : f32
      %79 = vector.broadcast %cst_51 : f32 to vector<1x64x1xf32>
      %80 = arith.maximumf %78, %79 : vector<1x64x1xf32>
      %81 = math.rsqrt %80 : vector<1x64x1xf32>
      %82 = vector.broadcast %81 : vector<1x64x1xf32> to vector<1x64x32xf32>
      %83 = arith.mulf %75, %82 : vector<1x64x32xf32>
      %c0_52 = arith.constant 0 : index
      %c0_53 = arith.constant 0 : index
      %c0_54 = arith.constant 0 : index
      %84 = vector.load %arg3[%c0_52, %c0_53, %c0_54] : memref<1x8x32xf32, #tpu.memory_space<vmem>>, vector<1x8x32xf32>
      %85 = arith.mulf %84, %84 : vector<1x8x32xf32>
      %cst_55 = arith.constant dense<0.000000e+00> : vector<1x8xf32>
      %86 = vector.multi_reduction <add>, %85, %cst_55 [2] : vector<1x8x32xf32> to vector<1x8xf32>
      %87 = vector.shape_cast %86 : vector<1x8xf32> to vector<1x8x1xf32>
      %cst_56 = arith.constant 1.000000e-24 : f32
      %88 = vector.broadcast %cst_56 : f32 to vector<1x8x1xf32>
      %89 = arith.maximumf %87, %88 : vector<1x8x1xf32>
      %90 = math.rsqrt %89 : vector<1x8x1xf32>
      %91 = vector.broadcast %90 : vector<1x8x1xf32> to vector<1x8x32xf32>
      %92 = arith.mulf %84, %91 : vector<1x8x32xf32>
      %93 = arith.truncf %83 : vector<1x64x32xf32> to vector<1x64x32xbf16>
      %94 = arith.truncf %92 : vector<1x8x32xf32> to vector<1x8x32xbf16>
      %c0_57 = arith.constant 0 : index
      %c0_58 = arith.constant 0 : index
      %c0_59 = arith.constant 0 : index
      %95 = vector.load %arg6[%c0_57, %c0_58, %c0_59] : memref<1x64x32xbf16, #tpu.memory_space<vmem>>, vector<1x64x32xbf16>
      tpu.vector_store %arg6[%c0_57, %c0_58, %c0_59], %93 {strides = array<i32>} : memref<1x64x32xbf16, #tpu.memory_space<vmem>>, vector<1x64x32xbf16>,
      %c0_60 = arith.constant 0 : index
      %c0_61 = arith.constant 0 : index
      %c0_62 = arith.constant 0 : index
      %96 = vector.load %arg7[%c0_60, %c0_61, %c0_62] : memref<1x8x32xbf16, #tpu.memory_space<vmem>>, vector<1x8x32xbf16>
      tpu.vector_store %arg7[%c0_60, %c0_61, %c0_62], %94 {strides = array<i32>} : memref<1x8x32xbf16, #tpu.memory_space<vmem>>, vector<1x8x32xbf16>,
      "tpu.trace_start"() <{level = 10 : i32, message = "bkd,bnd->bkn"}> : () -> ()
      %cst_63 = arith.constant dense<0.000000e+00> : vector<1x8x64xf32>
      %97 = tpu.matmul %94, %93, %cst_63 {dimension_numbers = #tpu.dot_dimension_numbers<[2], [2], [1], [1], [0, 0, 0, 1, 1, 1], [0], [0]>} : vector<1x8x32xbf16>, vector<1x64x32xbf16>, vector<1x8x64xf32> -> vector<1x8x64xf32>
      "tpu.trace_stop"() : () -> ()
      %cst_64 = arith.constant 1.000000e+01 : f32
      %98 = vector.broadcast %cst_64 : f32 to vector<1x8x64xf32>
      %99 = arith.mulf %97, %98 : vector<1x8x64xf32>
      %cst_65 = arith.constant dense<0xFF800000> : vector<1x8xf32>
      %100 = vector.multi_reduction <maximumf>, %99, %cst_65 [2] : vector<1x8x64xf32> to vector<1x8xf32>
      %101 = vector.shape_cast %100 : vector<1x8xf32> to vector<1x8x1xf32>
      %102 = vector.broadcast %101 : vector<1x8x1xf32> to vector<1x8x64xf32>
      %103 = arith.subf %99, %102 : vector<1x8x64xf32>
      %104 = math.exp %103 : vector<1x8x64xf32>
      %cst_66 = arith.constant dense<0.000000e+00> : vector<1x8xf32>
      %105 = vector.multi_reduction <add>, %104, %cst_66 [2] : vector<1x8x64xf32> to vector<1x8xf32>
      %106 = vector.shape_cast %105 : vector<1x8xf32> to vector<1x8x1xf32>
      %107 = vector.broadcast %106 : vector<1x8x1xf32> to vector<1x8x64xf32>
      %108 = arith.divf %104, %107 : vector<1x8x64xf32>
      %c0_67 = arith.constant 0 : index
      %c0_68 = arith.constant 0 : index
      %c0_69 = arith.constant 0 : index
      %109 = vector.load %arg8[%c0_67, %c0_68, %c0_69] : memref<1x8x64xf32, #tpu.memory_space<vmem>>, vector<1x8x64xf32>
      tpu.vector_store %arg8[%c0_67, %c0_68, %c0_69], %108 {strides = array<i32>} : memref<1x8x64xf32, #tpu.memory_space<vmem>>, vector<1x8x64xf32>,
      %cst_70 = arith.constant 0.000000e+00 : f32
      %110 = vector.broadcast %cst_70 : f32 to vector<1x8xf32>
      %c0_71 = arith.constant 0 : index
      %c0_72 = arith.constant 0 : index
      %111 = vector.load %arg9[%c0_71, %c0_72] : memref<1x8xf32, #tpu.memory_space<vmem>>, vector<1x8xf32>
      tpu.vector_store %arg9[%c0_71, %c0_72], %110 {strides = array<i32>} : memref<1x8xf32, #tpu.memory_space<vmem>>, vector<1x8xf32>,
      %cst_73 = arith.constant 0.000000e+00 : f32
      %112 = vector.broadcast %cst_73 : f32 to vector<1x1x2xf32>
      %c0_74 = arith.constant 0 : index
      %c0_75 = arith.constant 0 : index
      %c0_76 = arith.constant 0 : index
      %113 = vector.load %arg5[%c0_74, %c0_75, %c0_76] : memref<1x1x2xf32, #tpu.memory_space<vmem>>, vector<1x1x2xf32>
      tpu.vector_store %arg5[%c0_74, %c0_75, %c0_76], %112 {strides = array<i32>} : memref<1x1x2xf32, #tpu.memory_space<vmem>>, vector<1x1x2xf32>,
    } else {
    }
    %c0 = arith.constant 0 : index
    %c0_1 = arith.constant 0 : index
    %c0_2 = arith.constant 0 : index
    %3 = vector.load %arg6[%c0, %c0_1, %c0_2] : memref<1x64x32xbf16, #tpu.memory_space<vmem>>, vector<1x64x32xbf16>
    %c0_3 = arith.constant 0 : index
    %c0_4 = arith.constant 0 : index
    %c0_5 = arith.constant 0 : index
    %4 = vector.load %arg7[%c0_3, %c0_4, %c0_5] : memref<1x8x32xbf16, #tpu.memory_space<vmem>>, vector<1x8x32xbf16>
    %c0_6 = arith.constant 0 : index
    %c0_7 = arith.constant 0 : index
    %c0_8 = arith.constant 0 : index
    %5 = vector.load %arg8[%c0_6, %c0_7, %c0_8] : memref<1x8x64xf32, #tpu.memory_space<vmem>>, vector<1x8x64xf32>
    "tpu.trace_start"() <{level = 10 : i32, message = "bkd,bnd->bkn"}> : () -> ()
    %cst = arith.constant dense<0.000000e+00> : vector<1x8x64xf32>
    %6 = tpu.matmul %4, %3, %cst {dimension_numbers = #tpu.dot_dimension_numbers<[2], [2], [1], [1], [0, 0, 0, 1, 1, 1], [0], [0]>} : vector<1x8x32xbf16>, vector<1x64x32xbf16>, vector<1x8x64xf32> -> vector<1x8x64xf32>
    "tpu.trace_stop"() : () -> ()
    %cst_9 = arith.constant 1.000000e+01 : f32
    %7 = vector.broadcast %cst_9 : f32 to vector<1x8x64xf32>
    %8 = arith.mulf %6, %7 : vector<1x8x64xf32>
    %cst_10 = arith.constant dense<0xFF800000> : vector<1x64xf32>
    %9 = vector.multi_reduction <maximumf>, %8, %cst_10 [1] : vector<1x8x64xf32> to vector<1x64xf32>
    %10 = vector.shape_cast %9 : vector<1x64xf32> to vector<1x1x64xf32>
    %11 = vector.broadcast %10 : vector<1x1x64xf32> to vector<1x8x64xf32>
    %12 = arith.subf %8, %11 : vector<1x8x64xf32>
    %13 = math.exp %12 : vector<1x8x64xf32>
    %cst_11 = arith.constant dense<0.000000e+00> : vector<1x64xf32>
    %14 = vector.multi_reduction <add>, %13, %cst_11 [1] : vector<1x8x64xf32> to vector<1x64xf32>
    %15 = vector.shape_cast %14 : vector<1x64xf32> to vector<1x1x64xf32>
    %16 = tpu.reciprocal %15 {approx = true} : vector<1x1x64xf32> -> vector<1x1x64xf32>
    %17 = vector.broadcast %16 : vector<1x1x64xf32> to vector<1x8x64xf32>
    %18 = arith.mulf %13, %17 : vector<1x8x64xf32>
    %c0_12 = arith.constant 0 : index
    %c0_13 = arith.constant 0 : index
    %c0_14 = arith.constant 0 : index
    %19 = vector.load %arg6[%c0_12, %c0_13, %c0_14] : memref<1x64x32xbf16, #tpu.memory_space<vmem>>, vector<1x64x32xbf16>
    "tpu.trace_start"() <{level = 10 : i32, message = "bnd,bmd->bnm"}> : () -> ()
    %cst_15 = arith.constant dense<0.000000e+00> : vector<1x64x64xf32>
    %20 = tpu.matmul %3, %19, %cst_15 {dimension_numbers = #tpu.dot_dimension_numbers<[2], [2], [1], [1], [0, 0, 0, 1, 1, 1], [0], [0]>} : vector<1x64x32xbf16>, vector<1x64x32xbf16>, vector<1x64x64xf32> -> vector<1x64x64xf32>
    %cst_16 = arith.constant 5.000000e-01 : f32
    "tpu.trace_stop"() : () -> ()
    %21 = vector.broadcast %cst_16 : f32 to vector<1x64x64xf32>
    %22 = arith.cmpf oge, %20, %21 : vector<1x64x64xf32>
    %cst_17 = arith.constant -1.000000e+04 : f32
    %23 = vector.broadcast %cst_17 : f32 to vector<1x64x64xf32>
    %24 = arith.select %22, %20, %23 : vector<1x64x64xi1>, vector<1x64x64xf32>
    %cst_18 = arith.constant 1.000000e+01 : f32
    %25 = vector.broadcast %cst_18 : f32 to vector<1x64x64xf32>
    %26 = arith.mulf %24, %25 : vector<1x64x64xf32>
    %cst_19 = arith.constant dense<0xFF800000> : vector<1x64xf32>
    %27 = vector.multi_reduction <maximumf>, %26, %cst_19 [2] : vector<1x64x64xf32> to vector<1x64xf32>
    %28 = vector.shape_cast %27 : vector<1x64xf32> to vector<1x64x1xf32>
    %29 = vector.broadcast %28 : vector<1x64x1xf32> to vector<1x64x64xf32>
    %30 = arith.subf %26, %29 : vector<1x64x64xf32>
    %31 = math.exp %30 : vector<1x64x64xf32>
    %cst_20 = arith.constant dense<0.000000e+00> : vector<1x64xf32>
    %32 = vector.multi_reduction <add>, %31, %cst_20 [2] : vector<1x64x64xf32> to vector<1x64xf32>
    %33 = vector.shape_cast %32 : vector<1x64xf32> to vector<1x64x1xf32>
    %34 = tpu.reciprocal %33 {approx = true} : vector<1x64x1xf32> -> vector<1x64x1xf32>
    %35 = vector.broadcast %34 : vector<1x64x1xf32> to vector<1x64x64xf32>
    %36 = arith.mulf %31, %35 : vector<1x64x64xf32>
    %37 = arith.truncf %18 : vector<1x8x64xf32> to vector<1x8x64xbf16>
    %38 = arith.truncf %5 : vector<1x8x64xf32> to vector<1x8x64xbf16>
    "tpu.trace_start"() <{level = 10 : i32, message = "bkn,bkm->bnm"}> : () -> ()
    %cst_21 = arith.constant dense<0.000000e+00> : vector<1x64x64xf32>
    %39 = tpu.matmul %37, %38, %cst_21 {dimension_numbers = #tpu.dot_dimension_numbers<[1], [1], [2], [2], [0, 0, 0, 2, 1, 2], [0], [0]>} : vector<1x8x64xbf16>, vector<1x8x64xbf16>, vector<1x64x64xf32> -> vector<1x64x64xf32>
    "tpu.trace_stop"() : () -> ()
    %cst_22 = arith.constant 9.99999974E-5 : f32
    %40 = vector.broadcast %cst_22 : f32 to vector<1x64x64xf32>
    %41 = arith.addf %39, %40 : vector<1x64x64xf32>
    %42 = math.log %41 : vector<1x64x64xf32>
    %43 = arith.mulf %42, %36 : vector<1x64x64xf32>
    %44 = vector.shape_cast %43 : vector<1x64x64xf32> to vector<1x1x64x64xf32>
    %cst_23 = arith.constant dense<0.000000e+00> : vector<1xf32>
    %45 = vector.multi_reduction <add>, %44, %cst_23 [1, 2, 3] : vector<1x1x64x64xf32> to vector<1xf32>
    %46 = vector.shape_cast %45 : vector<1xf32> to vector<1x1x1x1xf32>
    %47 = vector.extract %46[0, 0, 0, 0] : f32 from vector<1x1x1x1xf32>
    %cst_24 = arith.constant 0.000000e+00 : f32
    %48 = arith.subf %cst_24, %47 : f32
    %c0_25 = arith.constant 0 : index
    %c0_26 = arith.constant 0 : index
    %49 = vector.load %arg9[%c0_25, %c0_26] : memref<1x8xf32, #tpu.memory_space<vmem>>, vector<1x8xf32>
    %50 = arith.mulf %5, %18 : vector<1x8x64xf32>
    %cst_27 = arith.constant dense<0.000000e+00> : vector<1x8xf32>
    %51 = vector.multi_reduction <add>, %50, %cst_27 [2] : vector<1x8x64xf32> to vector<1x8xf32>
    %52 = arith.addf %49, %51 : vector<1x8xf32>
    %c0_28 = arith.constant 0 : index
    %c0_29 = arith.constant 0 : index
    %53 = vector.load %arg9[%c0_28, %c0_29] : memref<1x8xf32, #tpu.memory_space<vmem>>, vector<1x8xf32>
    tpu.vector_store %arg9[%c0_28, %c0_29], %52 {strides = array<i32>} : memref<1x8xf32, #tpu.memory_space<vmem>>, vector<1x8xf32>,
    %c0_30 = arith.constant 0 : index
    %c0_31 = arith.constant 0 : index
    %c0_32 = arith.constant 0 : index
    %54 = vector.load %arg4[%c0_30, %c0_31, %c0_32] : memref<1x8x64xf32, #tpu.memory_space<vmem>>, vector<1x8x64xf32>
    tpu.vector_store %arg4[%c0_30, %c0_31, %c0_32], %18 {strides = array<i32>} : memref<1x8x64xf32, #tpu.memory_space<vmem>>, vector<1x8x64xf32>,
    %c0_i32_33 = arith.constant 0 : i32
    %55 = arith.cmpi eq, %arg1, %c0_i32_33 : i32
    %c0_34 = arith.constant 0 : index
    %c0_35 = arith.constant 0 : index
    %56 = vector.load %arg9[%c0_34, %c0_35] : memref<1x8xf32, #tpu.memory_space<vmem>>, vector<1x8xf32>
    %cst_36 = arith.constant 9.99999974E-5 : f32
    %57 = vector.broadcast %cst_36 : f32 to vector<1x8xf32>
    %58 = arith.addf %56, %57 : vector<1x8xf32>
    %59 = math.log %58 : vector<1x8xf32>
    %60 = vector.shape_cast %59 : vector<1x8xf32> to vector<1x1x8xf32>
    %cst_37 = arith.constant dense<0.000000e+00> : vector<1xf32>
    %61 = vector.multi_reduction <add>, %60, %cst_37 [1, 2] : vector<1x1x8xf32> to vector<1xf32>
    %62 = vector.shape_cast %61 : vector<1xf32> to vector<1x1x1xf32>
    %63 = vector.extract %62[0, 0, 0] : f32 from vector<1x1x1xf32>
    %cst_38 = arith.constant 0.000000e+00 : f32
    %64 = arith.subf %cst_38, %63 : f32
    %cst_39 = arith.constant 0.000000e+00 : f32
    %65 = arith.select %55, %64, %cst_39 : f32
    %66 = tpu.iota {dimensions = array<i32: 2>} : vector<1x1x2xi32>
    %c0_40 = arith.constant 0 : index
    %c0_41 = arith.constant 0 : index
    %c0_42 = arith.constant 0 : index
    %67 = vector.load %arg5[%c0_40, %c0_41, %c0_42] : memref<1x1x2xf32, #tpu.memory_space<vmem>>, vector<1x1x2xf32>
    %c0_i32_43 = arith.constant 0 : i32
    %68 = vector.broadcast %c0_i32_43 : i32 to vector<1x1x2xi32>
    %69 = arith.cmpi eq, %66, %68 : vector<1x1x2xi32>
    %70 = vector.broadcast %65 : f32 to vector<1x1x2xf32>
    %71 = vector.broadcast %48 : f32 to vector<1x1x2xf32>
    %72 = arith.select %69, %70, %71 : vector<1x1x2xi1>, vector<1x1x2xf32>
    %73 = arith.addf %67, %72 : vector<1x1x2xf32>
    %c0_44 = arith.constant 0 : index
    %c0_45 = arith.constant 0 : index
    %c0_46 = arith.constant 0 : index
    %74 = vector.load %arg5[%c0_44, %c0_45, %c0_46] : memref<1x1x2xf32, #tpu.memory_space<vmem>>, vector<1x1x2xf32>
    tpu.vector_store %arg5[%c0_44, %c0_45, %c0_46], %73 {strides = array<i32>} : memref<1x1x2xf32, #tpu.memory_space<vmem>>, vector<1x1x2xf32>,
    return
  }
  func.func @transform_0(%arg0: i32, %arg1: i32) -> (i32, i32, i32) {
    %c0_i32 = arith.constant 0 : i32
    %c0_i32_0 = arith.constant 0 : i32
    %c0_i32_1 = arith.constant 0 : i32
    return %arg0, %c0_i32, %c0_i32_0 : i32, i32, i32
  }
  func.func @transform_1(%arg0: i32, %arg1: i32) -> (i32, i32, i32) {
    %c0_i32 = arith.constant 0 : i32
    %c0_i32_0 = arith.constant 0 : i32
    %c0_i32_1 = arith.constant 0 : i32
    return %arg0, %c0_i32, %c0_i32_0 : i32, i32, i32
  }
  func.func @transform_2(%arg0: i32, %arg1: i32) -> (i32, i32, i32) {
    %c0_i32 = arith.constant 0 : i32
    %c0_i32_0 = arith.constant 0 : i32
    return %arg0, %c0_i32, %arg1 : i32, i32, i32
  }
  func.func @transform_3(%arg0: i32, %arg1: i32) -> (i32, i32, i32) {
    %c0_i32 = arith.constant 0 : i32
    %c0_i32_0 = arith.constant 0 : i32
    %c0_i32_1 = arith.constant 0 : i32
    return %arg0, %c0_i32, %c0_i32_0 : i32, i32, i32
  }
}

</mosaic_0001>

<bundles_post_ra>
// kernel: sacrw_forward.1
= control target key start
LH: loop header
LB: loop body
LE: loop exit
PB: predicated region body
PF: predicated region fallthrough
CT: control target
= control target key end

     0   :  { %s1306_s12 = smov 0   ;;  %s1308_s13 = smov 0   ;;  %s1552_s0 = inlined_call_operand.vmem [shape: f32[2,64,32], index: 0, kind: input, shape index: {}]   ;;  %s1553_s1 = inlined_call_operand.vmem [shape: f32[2,8,32], index: 1, kind: input, shape index: {}]   ;;  %s1554_s2 = inlined_call_operand.vmem [shape: f32[2,8,64], index: 2, kind: output, shape index: {0}]   ;;  %s1555_s3 = inlined_call_operand.vmem [shape: f32[2,1,2], index: 3, kind: output, shape index: {1}]  }
   0x1   :  { %s1310_s14 = smov 0  }
   0x2 LB: > { %s26_s15 = sadd.s32 1, %s1276_s13  ;;  %p1053_p0 = scmp.ge.s32.totalorder %s1280_s14, 1  ;;  %s1280_s14 = sphi %s1310_s14, %s14_s14   ;;  %s1276_s13 = sphi %s1308_s13, %s1557_s13   ;;  %s1272_s12 = sphi %s1306_s12, %s1556_s12  }
   0x3   : > { %p28_p1 = scmp.ge.s32.totalorder %s26_s15, 2  ;;  %p163_p2 = scmp.lt.s32.totalorder %s1280_s14, 3 }
   0x5   : > { %s1559_s15 = smov (%p28_p1, %s26_s15), 0  ;;  %p164_p3 = pnand %p1053_p0, %p163_p2 }
   0x6   : > { %p196_p4 = scmp.lt.s32.totalorder (!%p164_p3), %s1272_s12, 1  ;;  %vm236_vm0 = vcmask (!%p164_p3), 261120   ;;  %v1282_v27 = vmov (!%p164_p3), 0.0   ;;  %vm1283_vm1 = vmmov (!%p164_p3), 0   ;;  %vm302_vm2 = vcmask (!%p164_p3), 257024  }
   0x7   : > { %167 = sbr.rel (%p164_p3) target bundleno = 1292 (0x50c), region = 28  ;;  %1094 = vmatprep.subr.bf16.mxu0 (!%p164_p3), %v1282_v27  ;;  %1106 = vmatprep.subr.bf16.mxu1 (!%p164_p3), %v1282_v27  ;;  %vm360_vm3 = vcmask (!%p164_p3), 523264   ;;  %vm671_vm11 = vcmask (!%p164_p3), 64512   ;;  %vm684_vm13 = vcmask (!%p164_p3), 1043456   ;;  %vm373_vm14 = vcmask (!%p164_p3), 57344  }
   0x8   : > { %1102 = vmatprep.mubr.msk.bf16.mxu0 (!%p164_p3), %vm1283_vm1, %v1282_v27  ;;  %1114 = vmatprep.mubr.msk.bf16.mxu1 (!%p164_p3), %vm1283_vm1, %v1282_v27  ;;  %374 = vst.msk [vmem:[#allocation5] sm:$0x1] (!%p164_p3), %vm373_vm14, %v1282_v27  ;;  %vm375_vm15 = vcmask (!%p164_p3), 8192  }
   0xe   : > { %s1561_s12 = smov (!%p196_p4, %s1272_s12), 1 }
   0xf   : > { %s1070_s16 = sshll.u32 %s1561_s12, 6  ;;  %s1056_s20 = sshll.u32 %s1561_s12, 3 }
  0x10   : > { %s200_s19 = scalar_lea.vmem %s1552_s0, %s1070_s16  ;;  %s204_s23 = scalar_lea.vmem %s1553_s1, %s1056_s20 }
  0x11   : > { %v1330_v0 = vld [vmem:[%s200_s19] sm:$0xff]  ;;  %v1332_v1 = vld [vmem:[%s200_s19 + $0x10] sm:$0xff]  ;;  %v1334_v2 = vld [vmem:[%s200_s19 + $0x8] sm:$0xff]  ;;  %s211_s26 = scalar_lea.vmem %s1554_s2, %s1056_s20  ;;  %s214_s29 = scalar_lea.vmem %s1555_s3, %s1561_s12 }
  0x12   : > { %v228_v3 = vmul.f32 %v1330_v0, %v1330_v0  ;;  %v230_v4 = vmul.f32 %v1332_v1, %v1332_v1  ;;  %v229_v5 = vmul.f32 %v1334_v2, %v1334_v2  ;;  %v1342_v6 = vld [vmem:[%s200_s19 + $0x18] sm:$0xff]  ;;  %v1346_v8 = vld [vmem:[%s200_s19 + $0x28] sm:$0xff]  ;;  %v1348_v9 = vld [vmem:[%s200_s19 + $0x20] sm:$0xff]  ;;  %376 = vst.msk [vmem:[%s214_s29] sm:$0x1] %vm375_vm15, %v1282_v27 }
  0x13   : > { %v231_v7 = vmul.f32 %v1342_v6, %v1342_v6  ;;  %v233_v14 = vmul.f32 %v1346_v8, %v1346_v8  ;;  %v232_v15 = vmul.f32 %v1348_v9, %v1348_v9  ;;  %v1359_v16 = vld [vmem:[%s200_s19 + $0x38] sm:$0xff]  ;;  %v1361_v17 = vld [vmem:[%s200_s19 + $0x30] sm:$0xff]  ;;  %v1374_v22 = vld [vmem:[%s204_s23] sm:$0xff] }
  0x14   : > { %v237_v10 = vsel %vm236_vm0, %v228_v3, 0.0  ;;  %v243_v11 = vsel %vm236_vm0, %v230_v4, 0.0  ;;  %v240_v12 = vsel %vm236_vm0, %v229_v5, 0.0  ;;  %v235_v20 = vmul.f32 %v1359_v16, %v1359_v16 }
  0x15   : > { %238 = vadd.xlane.f32.xlu0 %v237_v10  ;;  %244 = vadd.xlane.f32.xlu1 %v243_v11  ;;  %v246_v13 = vsel %vm236_vm0, %v231_v7, 0.0  ;;  %v252_v18 = vsel %vm236_vm0, %v233_v14, 0.0  ;;  %v249_v19 = vsel %vm236_vm0, %v232_v15, 0.0  ;;  %v234_v21 = vmul.f32 %v1361_v17, %v1361_v17 }
  0x16   : > { %v258_v23 = vsel %vm236_vm0, %v235_v20, 0.0  ;;  %v286_v25 = vmul.f32 %v1374_v22, %v1374_v22 }
  0x17   : > { %v255_v24 = vsel %vm236_vm0, %v234_v21, 0.0 }
  0x18   : > { %v287_v26 = vsel %vm236_vm0, %v286_v25, 0.0 }
  0x19   : > { %241 = vadd.xlane.f32.xlu0 %v240_v12  ;;  %247 = vadd.xlane.f32.xlu1 %v246_v13 }
  0x1d   : > { %253 = vadd.xlane.f32.xlu1 %v252_v18  ;;  %250 = vadd.xlane.f32.xlu0 %v249_v19 }
  0x21   : > { %259 = vadd.xlane.f32.xlu1 %v258_v23  ;;  %256 = vadd.xlane.f32.xlu0 %v255_v24 }
  0x25   : > { %288 = vadd.xlane.f32.xlu0 %v287_v26 }
  0xa2   : > { %v239_v28 = vpop.xlane.xlu0 %238  ;;  %v245_v29 = vpop.xlane.xlu1 %244 }
  0xa3   : > { %v261_v30 = vmax.f32 %v239_v28, 1e-24  ;;  %v263_v31 = vmax.f32 %v245_v29, 1e-24 }
  0xa5   : > { %1182 = vrsqrt.f32 %v263_v31 }
  0xa6   : > { %v242_v32 = vpop.xlane.xlu0 %241  ;;  %v248_v33 = vpop.xlane.xlu1 %247  ;;  %1184 = vrsqrt.f32 %v261_v30 }
  0xa7   : > { %v262_v34 = vmax.f32 %v242_v32, 1e-24  ;;  %v264_v35 = vmax.f32 %v248_v33, 1e-24 }
  0xa9   : > { %1186 = vrsqrt.f32 %v262_v34 }
  0xaa   : > { %1188 = vrsqrt.f32 %v264_v35  ;;  %v254_v36 = vpop.xlane.xlu1 %253  ;;  %v251_v37 = vpop.xlane.xlu0 %250 }
  0xab   : > { %v266_v38 = vmax.f32 %v254_v36, 1e-24  ;;  %v265_v39 = vmax.f32 %v251_v37, 1e-24 }
  0xad   : > { %1190 = vrsqrt.f32 %v266_v38 }
  0xae   : > { %1192 = vrsqrt.f32 %v265_v39  ;;  %v260_v40 = vpop.xlane.xlu1 %259  ;;  %v257_v41 = vpop.xlane.xlu0 %256 }
  0xaf   : > { %v268_v42 = vmax.f32 %v260_v40, 1e-24  ;;  %v267_v43 = vmax.f32 %v257_v41, 1e-24  ;;  %v1183_v44 = vpop.eup %1182 }
  0xb0   : > { %v1185_v45 = vpop.eup %1184  ;;  %v279_v48 = vmul.f32 %v1183_v44, %v1332_v1 }
  0xb1   : > { %1194 = vrsqrt.f32 %v268_v42  ;;  %v277_v51 = vmul.f32 %v1185_v45, %v1330_v0 }
  0xb2   : > { %1196 = vrsqrt.f32 %v267_v43  ;;  %v289_v46 = vpop.xlane.xlu0 %288 }
  0xb3   : > { %v1187_v47 = vpop.eup %1186  ;;  %v290_v49 = vmax.f32 %v289_v46, 1e-24 }
  0xb4   : > { %v1189_v50 = vpop.eup %1188  ;;  %v278_v52 = vmul.f32 %v1187_v47, %v1334_v2 }
  0xb5   : > { %v280_v53 = vmul.f32 %v1189_v50, %v1342_v6  ;;  %1198 = vrsqrt.f32 %v290_v49 }
  0xb6   : > { %v293_v54 = vpack.c.bf16 %v278_v52, %v277_v51 }
  0xb7   : > { %v1191_v55 = vpop.eup %1190  ;;  %v294_v56 = vpack.c.bf16 %v280_v53, %v279_v48 }
  0xb8   : > { %v1193_v57 = vpop.eup %1192  ;;  %298 = vst.msk [vmem:[#allocation2] sm:$0xff] %vm236_vm0, %v293_v54  ;;  %v308_v58 = vsel %vm236_vm0, %v293_v54, 0  ;;  %v282_v59 = vmul.f32 %v1191_v55, %v1346_v8 }
  0xb9   : > { %1095 = vmatpush3.bf16.xpose.msra.mxu0 %v308_v58  ;;  %299 = vst.msk [vmem:[#allocation2 + $0x8] sm:$0xff] %vm236_vm0, %v294_v56  ;;  %v281_v60 = vmul.f32 %v1193_v57, %v1348_v9  ;;  %v311_v5 = vsel %vm236_vm0, %v294_v56, 0 }
  0xba   : > { %1096 = vmatprep.subr.bf16.mxu0 %v1282_v27 }
  0xbb   : > { %v1195_v61 = vpop.eup %1194  ;;  %v295_v62 = vpack.c.bf16 %v282_v59, %v281_v60 }
  0xbc   : > { %v1197_v63 = vpop.eup %1196  ;;  %v284_v0 = vmul.f32 %v1195_v61, %v1359_v16 }
  0xbd   : > { %300 = vst.msk [vmem:[#allocation2 + $0x10] sm:$0xff] %vm236_vm0, %v295_v62  ;;  %v283_v1 = vmul.f32 %v1197_v63, %v1361_v17  ;;  %v314_v10 = vsel %vm236_vm0, %v295_v62, 0 }
  0xbf   : > { %v1199_v2 = vpop.eup %1198  ;;  %v377_v3 = vld [vmem:[#allocation2] sm:$0xff]  ;;  %v296_v4 = vpack.c.bf16 %v284_v0, %v283_v1 }
  0xc0   : > { %v388_v6 = vsel %vm236_vm0, %v377_v3, 0  ;;  %v292_v7 = vmul.f32 %v1199_v2, %v1374_v22  ;;  %v378_v9 = vld [vmem:[#allocation2 + $0x8] sm:$0xff] }
  0xc1   : > { %1097 = vmatpush3.bf16.xpose.msra.mxu0 %v311_v5  ;;  %1107 = vmatpush3.bf16.xpose.msra.mxu1 %v388_v6  ;;  %301 = vst.msk [vmem:[#allocation2 + $0x18] sm:$0xff] %vm236_vm0, %v296_v4  ;;  %v391_v11 = vsel %vm236_vm0, %v378_v9, 0  ;;  %v317_v13 = vsel %vm236_vm0, %v296_v4, 0 }
  0xc2   : > { %1098 = vmatprep.subr.bf16.mxu0 %v1282_v27  ;;  %1108 = vmatprep.subr.bf16.mxu1 %v1282_v27  ;;  %v297_v8 = vpack.c.bf16 %v292_v7, %v292_v7 }
  0xc4   : > { %303 = vst.msk [vmem:[#allocation3] sm:$0xf] %vm302_vm2, %v297_v8  ;;  %v379_v12 = vld [vmem:[#allocation2 + $0x10] sm:$0xff] }
  0xc5   : > { %v394_v14 = vsel %vm236_vm0, %v379_v12, 0 }
  0xc8   : > { %v380_v15 = vld [vmem:[#allocation2 + $0x18] sm:$0xff] }
  0xc9   : > { %1099 = vmatpush3.bf16.xpose.msra.mxu0 %v314_v10  ;;  %1109 = vmatpush3.bf16.xpose.msra.mxu1 %v391_v11  ;;  %v397_v16 = vsel %vm236_vm0, %v380_v15, 0 }
  0xca   : > { %1100 = vmatprep.subr.bf16.mxu0 %v1282_v27  ;;  %1110 = vmatprep.subr.bf16.mxu1 %v1282_v27 }
  0xcb   : > { %v381_v17 = vld [vmem:[#allocation3] sm:$0xf] }
  0xd1   : > { %1101 = vmatpush3.bf16.xpose.msra.mxu0 %v317_v13  ;;  %1111 = vmatpush3.bf16.xpose.msra.mxu1 %v394_v14 }
  0xd2   : > { %1144 = vmatprep.subr.msk.bf16.mxu0 %vm236_vm0, %v377_v3  ;;  %1112 = vmatprep.subr.bf16.mxu1 %v1282_v27  ;;  %v933_v27 = vld [vmem:[%s214_s29] sm:$0x1] }
  0xd8   : > { %1103 = vmatmul.mubr.msk.bf16.vlgmr.msra.gmra.mrb[0].mxu0 %vm236_vm0, %v297_v8 }
  0xd9   : > { %1113 = vmatpush3.bf16.xpose.msra.mxu1 %v397_v16  ;;  %1119 = vmatpush3.bf16.xpose.msra.mxu0 %v388_v6 }
  0xda   : > { %1126 = vmatprep.mubr.msk.bf16.mxu0 %vm236_vm0, %v377_v3  ;;  %1145 = vmatprep.subr.msk.bf16.mxu0 %vm236_vm0, %v378_v9 }
  0xe0   : > { %1115 = vmatmul.mubr.msk.bf16.vlgmr.msra.gmra.mrb[0].mxu1 %vm236_vm0, %v381_v17 }
  0xe1   : > { %1121 = vmatpush3.bf16.xpose.msra.mxu0 %v391_v11 }
  0xe2   : > { %1146 = vmatprep.subr.msk.bf16.mxu0 %vm236_vm0, %v379_v12 }
  0xe9   : > { %1123 = vmatpush3.bf16.xpose.msra.mxu0 %v394_v14 }
  0xea   : > { %1147 = vmatprep.subr.msk.bf16.mxu0 %vm236_vm0, %v380_v15 }
  0xf1   : > { %1125 = vmatpush3.bf16.xpose.msra.mxu0 %v397_v16 }
  0xf8   : > { %1127 = vmatmul.mubr.msk.bf16.vlgmr.msra.gmra.mrb[4].mxu0 %vm236_vm0, %v378_v9 }
  0xf9   : > { %1130 = vmatprep.mubr.msk.bf16.mxu0 %vm236_vm0, %v379_v12 }
 0x100   : > { %1131 = vmatmul.mubr.msk.bf16.gmra.mrb[8].mxu0 %vm236_vm0, %v380_v15 }
 0x1ab   : > { %v353_v18 = vpop.f32.mrb[0].mxu0 }
 0x1ac   : > { %v359_v19 = vmul.f32 10.0, %v353_v18  ;;  %v1104_v20 = vpop.f32.mrb[1].mxu0 }
 0x1ad   : > { %v356_v21 = vpop.f32.mrb[2].mxu0 }
 0x1ae   : > { %v1105_v22 = vpop.f32.mrb[3].mxu0  ;;  %v361_v23 = vsel %vm360_vm3, %v359_v19, -inf }
 0x1af   : > { %362 = vmax.xlane.f32.xlu1 %v361_v23 }
 0x1b3   : > { %v433_v24 = vpop.f32.mrb[0].mxu1 }
 0x1b4   : > { %v439_v25 = vmul.f32 10.0, %v433_v24  ;;  %v1116_v26 = vpop.f32.mrb[1].mxu1 }
 0x1b5   : > { %v436_v28 = vpop.f32.mrb[2].mxu1 }
 0x1b6   : > { %v441_v29 = vsel %vm360_vm3, %v439_v25, -inf  ;;  %v1117_v30 = vpop.f32.mrb[3].mxu1 }
 0x1b7   : > { %v442_v31 = vrot.slane %v441_v29, 4 }
 0x1b9   : > { %v443_v32 = vmax.f32 %v441_v29, %v442_v31 }
 0x1bb   : > { %v444_v33 = vrot.slane %v443_v32, 2 }
 0x1bd   : > { %v445_v34 = vmax.f32 %v443_v32, %v444_v33 }
 0x1bf   : > { %v446_v35 = vrot.slane %v445_v34, 1 }
 0x1c1   : > { %v447_v36 = vmax.f32 %v445_v34, %v446_v35 }
 0x1c3   : > { %v448_v37 = vsub.f32 %v439_v25, %v447_v36 }
 0x1c5   : > { %v449_v38 = vmul.f32 1.442695, %v448_v37 }
 0x1c7   : > { %1200 = vpow2.f32 %v449_v38 }
 0x1cb   : > { %v1128_v39 = vpop.f32.mrb[4].mxu0 }
 0x1cc   : > { %v510_v40 = vpop.f32.mrb[5].mxu0  ;;  %vm543_vm6 = vcmp.ge.f32.partialorder %v1128_v39, 0.5 }
 0x1cd   : > { %v1129_v41 = vpop.f32.mrb[6].mxu0  ;;  %vm541_vm4 = vcmp.ge.f32.partialorder %v510_v40, 0.5  ;;  %v551_v4 = vsel %vm543_vm6, %v1128_v39, -10000.0 }
 0x1ce   : > { %v513_v42 = vpop.f32.mrb[7].mxu0  ;;  %v549_v61 = vsel %vm541_vm4, %v510_v40, -10000.0  ;;  %vm544_vm7 = vcmp.ge.f32.partialorder %v1129_v41, 0.5  ;;  %v559_v5 = vmul.f32 10.0, %v551_v4 }
 0x1cf   : > { %vm542_vm5 = vcmp.ge.f32.partialorder %v513_v42, 0.5  ;;  %v557_v63 = vmul.f32 10.0, %v549_v61  ;;  %v552_v7 = vsel %vm544_vm7, %v1129_v41, -10000.0 }
 0x1d0   : > { %v550_v1 = vsel %vm542_vm5, %v513_v42, -10000.0  ;;  %v560_v8 = vmul.f32 10.0, %v552_v7  ;;  %v571_v9 = vsel %vm360_vm3, %v559_v5, -inf  ;;  %v1284_v7 = vmov 0  }
 0x1d1   : > { %v1201_v43 = vpop.eup %1200  ;;  %v558_v2 = vmul.f32 10.0, %v550_v1  ;;  %v565_v3 = vsel %vm360_vm3, %v557_v63, -inf  ;;  %1181 = vset.pattern.permute.xlu0 %v1284_v7 }
 0x1d2   : > { %v451_v44 = vsel %vm360_vm3, %v1201_v43, 0.0  ;;  %v574_v12 = vsel %vm360_vm3, %v560_v8, -inf }
 0x1d3   : > { %v452_v45 = vrot.slane %v451_v44, 4  ;;  %v1132_v46 = vpop.f32.mrb[8].mxu0  ;;  %v568_v6 = vsel %vm360_vm3, %v558_v2, -inf }
 0x1d4   : > { %v526_v47 = vpop.f32.mrb[9].mxu0  ;;  %vm547_vm10 = vcmp.ge.f32.partialorder %v1132_v46, 0.5 }
 0x1d5   : > { %v453_v48 = vadd.f32 %v452_v45, %v451_v44  ;;  %v1425_v49 = vpop.f32.mrb[10].mxu0  ;;  %vm545_vm8 = vcmp.ge.f32.partialorder %v526_v47, 0.5  ;;  %v555_v16 = vsel %vm547_vm10, %v1132_v46, -10000.0 }
 0x1d6   : > { %v529_v50 = vpop.f32.mrb[11].mxu0  ;;  %v553_v10 = vsel %vm545_vm8, %v526_v47, -10000.0  ;;  %v563_v17 = vmul.f32 10.0, %v555_v16  ;;  %vm548_vm12 = vcmp.ge.f32.partialorder %v1425_v49, 0.5 }
 0x1d7   : > { %v454_v51 = vrot.slane %v453_v48, 2  ;;  %vm546_vm9 = vcmp.ge.f32.partialorder %v529_v50, 0.5  ;;  %v561_v11 = vmul.f32 10.0, %v553_v10  ;;  %v556_v37 = vsel %vm548_vm12, %v1425_v49, -10000.0 }
 0x1d8   : > { %v554_v13 = vsel %vm546_vm9, %v529_v50, -10000.0  ;;  %v1451_v45 = vmul.f32 10.0, %v556_v37 }
 0x1d9   : > { %v455_v52 = vadd.f32 %v454_v51, %v453_v48  ;;  %v562_v14 = vmul.f32 10.0, %v554_v13  ;;  %v577_v15 = vsel %vm360_vm3, %v561_v11, -inf }
 0x1db   : > { %v456_v53 = vrot.slane %v455_v52, 1  ;;  %v580_v18 = vsel %vm360_vm3, %v562_v14, -inf }
 0x1dd   : > { %v457_v54 = vadd.f32 %v456_v53, %v455_v52 }
 0x1df   : > { %1202 = vrcp.f32 %v457_v54  ;;  %v586_v54 = vsel %vm360_vm3, %v1451_v45, -inf }
 0x1e9   : > { %v1203_v55 = vpop.eup %1202 }
 0x1ea   : > { %v1432_v56 = vmul.f32 %v1203_v55, %v1201_v43 }
 0x1ec   : > { %v653_v57 = vpack.c.bf16 %v1432_v56, %v1432_v56  ;;  %916 = vst.msk [vmem:[%s211_s26] sm:$0xff] %vm360_vm3, %v1432_v56 }
 0x1ee   : > { %655 = vxpose.xlu1.c.b16.start.end [1/1] (short) (narrow) %v653_v57, 64 }
 0x23c   : > { %v363_v58 = vpop.xlane.xlu1 %362 }
 0x23d   : > { %v364_v59 = vsub.f32 %v359_v19, %v363_v58  ;;  %v583_v19 = vsel %vm360_vm3, %v563_v17, -inf }
 0x23f   : > { %v365_v60 = vmul.f32 1.442695, %v364_v59 }
 0x241   : > { %1204 = vpow2.f32 %v365_v60 }
 0x24b   : > { %v1205_v62 = vpop.eup %1204 }
 0x24c   : > { %v367_v0 = vsel %vm360_vm3, %v1205_v62, 0.0 }
 0x24d   : > { %368 = vadd.xlane.f32.xlu0 %v367_v0 }
 0x251   : > { %566 = vmax.xlane.f32.xlu0 %v565_v3 }
 0x254   : > { %v663_v20 = vpop.trf.xlu1 }
 0x255   : > { %569 = vmax.xlane.f32.xlu0 %v568_v6  ;;  %1136 = vmatprep.mubr.msk.bf16.mxu1 %vm671_vm11, %v663_v20 }
 0x258   : > { %v664_v40 = vpop.trf.xlu1 }
 0x259   : > { %572 = vmax.xlane.f32.xlu0 %v571_v9  ;;  %v1285_v9 = vmov 1966171168  }
 0x25a   : > { %v845_v10 = vunpack.c.l.s4 %v1285_v9 }
 0x25c   : > { %v665_v52 = vpop.trf.xlu1 }
 0x25d   : > { %575 = vmax.xlane.f32.xlu0 %v574_v12  ;;  %v846_v12 = vunpack.c.0.s8 %v845_v10 }
 0x260   : > { %v666_v61 = vpop.trf.xlu1 }
 0x261   : > { %578 = vmax.xlane.f32.xlu0 %v577_v15 }
 0x265   : > { %581 = vmax.xlane.f32.xlu0 %v580_v18 }
 0x269   : > { %584 = vmax.xlane.f32.xlu0 %v583_v19 }
 0x2da   : > { %v369_v21 = vpop.xlane.xlu0 %368 }
 0x2db   : > { %1206 = vrcp.f32 %v369_v21 }
 0x2de   : > { %v567_v22 = vpop.xlane.xlu0 %566 }
 0x2df   : > { %v589_v25 = vsub.f32 %v557_v63, %v567_v22 }
 0x2e1   : > { %v597_v30 = vmul.f32 1.442695, %v589_v25 }
 0x2e2   : > { %v570_v23 = vpop.xlane.xlu0 %569 }
 0x2e3   : > { %v590_v31 = vsub.f32 %v558_v2, %v570_v23 }
 0x2e5   : > { %v1207_v24 = vpop.eup %1206  ;;  %v599_v34 = vmul.f32 1.442695, %v590_v31 }
 0x2e6   : > { %v371_v26 = vmul.f32 %v1207_v24, %v1205_v62  ;;  %v573_v28 = vpop.xlane.xlu0 %572 }
 0x2e7   : > { %v591_v29 = vsub.f32 %v559_v5, %v573_v28 }
 0x2e8   : > { %372 = vst.msk [vmem:[#allocation4] sm:$0xff] %vm360_vm3, %v371_v26 }
 0x2e9   : > { %v601_v32 = vmul.f32 1.442695, %v591_v29 }
 0x2ea   : > { %v576_v33 = vpop.xlane.xlu0 %575 }
 0x2eb   : > { %1208 = vpow2.f32 %v601_v32  ;;  %v592_v35 = vsub.f32 %v560_v8, %v576_v33  ;;  %v808_v8 = vlaneseq }
 0x2ec   : > { %1210 = vpow2.f32 %v597_v30 }
 0x2ed   : > { %1212 = vpow2.f32 %v599_v34  ;;  %v603_v43 = vmul.f32 1.442695, %v592_v35 }
 0x2ee   : > { %v579_v36 = vpop.xlane.xlu0 %578 }
 0x2ef   : > { %v593_v38 = vsub.f32 %v561_v11, %v579_v36  ;;  %v382_v39 = vld [vmem:[#allocation4] sm:$0xff]  ;;  %v1488_v11 = vshrl.u32 %v808_v8, 7 }
 0x2f0   : > { %v654_v41 = vpack.c.bf16 %v382_v39, %v382_v39  ;;  %v803_v42 = vmul.f32 %v1432_v56, %v382_v39 }
 0x2f1   : > { %v605_v44 = vmul.f32 1.442695, %v593_v38  ;;  %v810_v13 = vsub.s32 0, %v1488_v11  ;;  %v818_v15 = vsub.s32 2, %v1488_v11  ;;  %v822_v16 = vsub.s32 3, %v1488_v11 }
 0x2f2   : > { %1148 = vmatprep.subr.msk.bf16.mxu1 %vm684_vm13, %v654_v41  ;;  %v582_v46 = vpop.xlane.xlu0 %581  ;;  %v686_v47 = vsel %vm684_vm13, %v654_v41, 0  ;;  %v804_v48 = vsel %vm360_vm3, %v803_v42, 0.0  ;;  %v830_v18 = vsub.s32 5, %v1488_v11  ;;  %v834_v19 = vsub.s32 6, %v1488_v11 }
 0x2f3   : > { %1214 = vpow2.f32 %v605_v44  ;;  %v594_v50 = vsub.f32 %v562_v14, %v582_v46  ;;  %1135 = vmatpush3.bf16.msra.mxu1 %v686_v47  ;;  %805 = vadd.xlane.f32.xlu0 %v804_v48  ;;  %v814_v14 = vsub.s32 1, %v1488_v11  ;;  %v838_v20 = vsub.s32 7, %v1488_v11 }
 0x2f4   : > { %1216 = vpow2.f32 %v603_v43  ;;  %v1499_v22 = vsub.s32 %v846_v12, %v1488_v11 }
 0x2f5   : > { %v1454_v49 = vpop.eup %1208  ;;  %v607_v51 = vmul.f32 1.442695, %v594_v50 }
 0x2f6   : > { %v585_v53 = vpop.xlane.xlu0 %584  ;;  %1137 = vmatmul.mubr.msk.bf16.vlgmr.msra.gmra.mrb[4].mxu1 %vm671_vm11, %v664_v40  ;;  %v619_v55 = vsel %vm360_vm3, %v1454_v49, 0.0  ;;  %v1461_v56 = vpop.eup %1210 }
 0x2f7   : > { %1218 = vpow2.f32 %v607_v51  ;;  %v595_v57 = vsub.f32 %v563_v17, %v585_v53  ;;  %587 = vmax.xlane.f32.xlu0 %v586_v54  ;;  %620 = vadd.xlane.f32.xlu1 %v619_v55  ;;  %v613_v59 = vsel %vm360_vm3, %v1461_v56, 0.0  ;;  %v1466_v60 = vpop.eup %1212  ;;  %v826_v17 = vsub.s32 4, %v1488_v11 }
 0x2f8   : > { %1140 = vmatprep.mubr.msk.bf16.mxu1 %vm671_vm11, %v665_v52  ;;  %v616_v63 = vsel %vm360_vm3, %v1466_v60, 0.0 }
 0x2f9   : > { %v609_v58 = vmul.f32 1.442695, %v595_v57 }
 0x2fb   : > { %1220 = vpow2.f32 %v609_v58  ;;  %614 = vadd.xlane.f32.xlu0 %v613_v59 }
 0x2fd   : > { %v1468_v62 = vpop.eup %1214 }
 0x2fe   : > { %1141 = vmatmul.mubr.msk.bf16.gmra.mrb[8].mxu1 %vm671_vm11, %v666_v61  ;;  %v625_v0 = vsel %vm360_vm3, %v1468_v62, 0.0  ;;  %v1475_v1 = vpop.eup %1216 }
 0x2ff   : > { %617 = vadd.xlane.f32.xlu0 %v616_v63  ;;  %626 = vadd.xlane.f32.xlu1 %v625_v0  ;;  %v622_v3 = vsel %vm360_vm3, %v1475_v1, 0.0 }
 0x301   : > { %v1477_v2 = vpop.eup %1218 }
 0x302   : > { %v628_v4 = vsel %vm360_vm3, %v1477_v2, 0.0 }
 0x303   : > { %623 = vadd.xlane.f32.xlu0 %v622_v3  ;;  %629 = vadd.xlane.f32.xlu1 %v628_v4 }
 0x305   : > { %v1483_v5 = vpop.eup %1220 }
 0x306   : > { %v631_v6 = vsel %vm360_vm3, %v1483_v5, 0.0 }
 0x307   : > { %632 = vadd.xlane.f32.xlu1 %v631_v6 }
 0x380   : > { %v806_v21 = vpop.xlane.xlu0 %805 }
 0x381   : > { %v811_v23 = vrot.slane %v806_v21, %v810_v13  ;;  %v815_v24 = vrot.slane %v806_v21, %v814_v14  ;;  %v819_v25 = vrot.slane %v806_v21, %v818_v15  ;;  %v823_v26 = vrot.slane %v806_v21, %v822_v16 }
 0x382   : > { %v827_v28 = vrot.slane %v806_v21, %v826_v17  ;;  %v831_v29 = vrot.slane %v806_v21, %v830_v18  ;;  %v835_v30 = vrot.slane %v806_v21, %v834_v19  ;;  %v839_v31 = vrot.slane %v806_v21, %v838_v20 }
 0x383   : > { %v840_v32 = vcombine.low %v811_v23, %v815_v24  ;;  %v841_v33 = vcombine.low %v819_v25, %v823_v26 }
 0x384   : > { %v588_v34 = vpop.xlane.xlu0 %587  ;;  %v842_v35 = vcombine.low %v827_v28, %v831_v29  ;;  %v843_v36 = vcombine.low %v835_v30, %v839_v31  ;;  %v621_v52 = vpop.xlane.xlu1 %620 }
 0x385   : > { %v596_v37 = vsub.f32 %v1451_v45, %v588_v34  ;;  %v850_v38 = vrot.slane %v840_v32, %v1499_v22  ;;  %v857_v39 = vrot.slane %v841_v33, %v1499_v22 }
 0x386   : > { %v864_v40 = vrot.slane %v842_v35, %v1499_v22  ;;  %v871_v41 = vrot.slane %v843_v36, %v1499_v22 }
 0x387   : > { %v611_v42 = vmul.f32 1.442695, %v596_v37  ;;  %v872_v43 = vcombine.low %v850_v38, %v857_v39 }
 0x388   : > { %v873_v44 = vcombine.low %v864_v40, %v871_v41  ;;  %v615_v51 = vpop.xlane.xlu0 %614 }
 0x389   : > { %1222 = vpow2.f32 %v611_v42  ;;  %v880_v46 = vrot.slane %v872_v43, %v1499_v22 }
 0x38a   : > { %v887_v47 = vrot.slane %v873_v44, %v1499_v22  ;;  %1224 = vrcp.f32 %v621_v52 }
 0x38b   : > { %1226 = vrcp.f32 %v615_v51 }
 0x38c   : > { %v888_v48 = vcombine.low %v880_v46, %v887_v47  ;;  %v618_v53 = vpop.xlane.xlu0 %617  ;;  %v627_v54 = vpop.xlane.xlu1 %626 }
 0x38d   : > { %1228 = vrcp.f32 %v618_v53 }
 0x38e   : > { %890 = vperm.xlu0 %1181, %v888_v48  }
 0x390   : > { %v624_v55 = vpop.xlane.xlu0 %623  ;;  %v630_v58 = vpop.xlane.xlu1 %629 }
 0x391   : > { %1230 = vrcp.f32 %v624_v55 }
 0x393   : > { %v1510_v45 = vpop.eup %1222 }
 0x394   : > { %v634_v50 = vsel %vm360_vm3, %v1510_v45, 0.0  ;;  %v633_v7 = vpop.xlane.xlu1 %632  ;;  %v1225_v10 = vpop.eup %1224 }
 0x395   : > { %635 = vadd.xlane.f32.xlu1 %v634_v50  ;;  %v1227_v14 = vpop.eup %1226  ;;  %v647_v30 = vmul.f32 %v1225_v10, %v1454_v49  ;;  %v802_v10 = vld [vmem:[#allocation5] sm:$0x1] }
 0x396   : > { %v645_v26 = vmul.f32 %v1227_v14, %v1461_v56 }
 0x397   : > { %v1229_v17 = vpop.eup %1228 }
 0x398   : > { %v646_v33 = vmul.f32 %v1229_v17, %v1466_v60 }
 0x39b   : > { %v1231_v19 = vpop.eup %1230 }
 0x39c   : > { %v648_v38 = vmul.f32 %v1231_v19, %v1475_v1 }
 0x3c9   : > { %v1138_v57 = vpop.f32.mrb[4].mxu1 }
 0x3ca   : > { %v731_v59 = vadd.f32 0.0001, %v1138_v57  ;;  %v722_v61 = vpop.f32.mrb[5].mxu1 }
 0x3cb   : > { %v723_v63 = vadd.f32 0.0001, %v722_v61  ;;  %v1139_v0 = vpop.f32.mrb[6].mxu1 }
 0x3cc   : > { %1232 = vlog2.f32 %v731_v59  ;;  %v734_v3 = vadd.f32 0.0001, %v1139_v0  ;;  %v725_v4 = vpop.f32.mrb[7].mxu1 }
 0x3cd   : > { %1234 = vlog2.f32 %v723_v63  ;;  %v726_v6 = vadd.f32 0.0001, %v725_v4 }
 0x3ce   : > { %1236 = vlog2.f32 %v734_v3 }
 0x3cf   : > { %1238 = vlog2.f32 %v726_v6 }
 0x3d0   : > { %1240 = vrcp.f32 %v627_v54 }
 0x3d1   : > { %v1142_v9 = vpop.f32.mrb[8].mxu1  ;;  %1242 = vrcp.f32 %v630_v58 }
 0x3d2   : > { %v747_v12 = vadd.f32 0.0001, %v1142_v9  ;;  %v738_v13 = vpop.f32.mrb[9].mxu1  ;;  %1244 = vrcp.f32 %v633_v7 }
 0x3d3   : > { %v739_v15 = vadd.f32 0.0001, %v738_v13  ;;  %v1143_v16 = vpop.f32.mrb[10].mxu1 }
 0x3d4   : > { %1246 = vlog2.f32 %v747_v12  ;;  %v741_v18 = vpop.f32.mrb[11].mxu1  ;;  %v750_v14 = vadd.f32 0.0001, %v1143_v16 }
 0x3d5   : > { %1248 = vlog2.f32 %v739_v15  ;;  %v742_v20 = vadd.f32 0.0001, %v741_v18 }
 0x3d6   : > { %v1233_v21 = vpop.eup %1232 }
 0x3d7   : > { %v1235_v23 = vpop.eup %1234  ;;  %1250 = vlog2.f32 %v742_v20  ;;  %v758_v25 = vmul.f32 0.6931472, %v1233_v21 }
 0x3d8   : > { %v1237_v24 = vpop.eup %1236  ;;  %v754_v28 = vmul.f32 0.6931472, %v1235_v23  ;;  %1252 = vlog2.f32 %v750_v14 }
 0x3d9   : > { %v1239_v29 = vpop.eup %1238  ;;  %v760_v32 = vmul.f32 0.6931472, %v1237_v24  ;;  %v771_v37 = vmul.f32 %v758_v25, %v647_v30 }
 0x3da   : > { %v769_v31 = vmul.f32 %v754_v28, %v645_v26  ;;  %v756_v34 = vmul.f32 0.6931472, %v1239_v29  ;;  %v1241_v35 = vpop.eup %1240 }
 0x3db   : > { %v1243_v36 = vpop.eup %1242  ;;  %v772_v56 = vmul.f32 %v760_v32, %v648_v38  ;;  %v780_v46 = vsel %vm360_vm3, %v771_v37, 0.0  ;;  %v649_v60 = vmul.f32 %v1241_v35, %v1468_v62 }
 0x3dc   : > { %v770_v39 = vmul.f32 %v756_v34, %v646_v33  ;;  %v1245_v40 = vpop.eup %1244  ;;  %v777_v42 = vsel %vm360_vm3, %v769_v31, 0.0  ;;  %v650_v1 = vmul.f32 %v1243_v36, %v1477_v2  ;;  %v893_v2 = vand.u32 127, %v808_v8 }
 0x3dd   : > { %v782_v52 = vsel %vm360_vm3, %v772_v56, 0.0  ;;  %v651_v53 = vmul.f32 %v1245_v40, %v1483_v5 }
 0x3de   : > { %v1247_v41 = vpop.eup %1246  ;;  %v778_v43 = vsel %vm360_vm3, %v770_v39, 0.0  ;;  %v896_v6 = vsub.s32 %v893_v2, %v1488_v11  ;;  %vm934_vm0 = vcmp.eq.s32.totalorder %v893_v2, 0 }
 0x3df   : > { %v1249_v44 = vpop.eup %1248  ;;  %v779_v49 = vadd.f32 %v778_v43, %v777_v42  ;;  %v766_v47 = vmul.f32 0.6931472, %v1247_v41 }
 0x3e0   : > { %v762_v48 = vmul.f32 0.6931472, %v1249_v44 }
 0x3e1   : > { %v1251_v50 = vpop.eup %1250  ;;  %v781_v51 = vadd.f32 %v780_v46, %v779_v49  ;;  %v775_v58 = vmul.f32 %v766_v47, %v651_v53 }
 0x3e2   : > { %v773_v54 = vmul.f32 %v762_v48, %v649_v60  ;;  %v764_v55 = vmul.f32 0.6931472, %v1251_v50  ;;  %v1253_v8 = vpop.eup %1252 }
 0x3e3   : > { %v783_v57 = vadd.f32 %v782_v52, %v781_v51  ;;  %v788_v3 = vsel %vm360_vm3, %v775_v58, 0.0  ;;  %v768_v19 = vmul.f32 0.6931472, %v1253_v8 }
 0x3e4   : > { %v784_v59 = vsel %vm360_vm3, %v773_v54, 0.0  ;;  %v774_v61 = vmul.f32 %v764_v55, %v650_v1 }
 0x3e5   : > { %v785_v63 = vadd.f32 %v784_v59, %v783_v57 }
 0x3e6   : > { %v786_v0 = vsel %vm360_vm3, %v774_v61, 0.0 }
 0x3e7   : > { %v787_v62 = vadd.f32 %v786_v0, %v785_v63 }
 0x3e9   : > { %v789_v4 = vadd.f32 %v788_v3, %v787_v62 }
 0x40d   : > { %v891_v7 = vpop.permute.xlu0 %890 }
 0x40e   : > { %v897_v5 = vrot.slane %v891_v7, %v896_v6 }
 0x410   : > { %v904_v9 = vrot.slane %v897_v5, %v1499_v22 }
 0x412   : > { %v911_v12 = vrot.slane %v904_v9, %v1499_v22 }
 0x414   : > { %v913_v13 = vadd.f32 %v911_v12, %v802_v10 }
 0x416   : > { %915 = vst.msk [vmem:[#allocation5] sm:$0x1] %vm373_vm14, %v913_v13 }
 0x41d   : > { %v917_v15 = vld [vmem:[#allocation5] sm:$0x1] }
 0x41e   : > { %v918_v18 = vadd.f32 0.0001, %v917_v15 }
 0x422   : > { %v636_v17 = vpop.xlane.xlu1 %635 }
 0x423   : > { %1254 = vrcp.f32 %v636_v17 }
 0x424   : > { %1256 = vlog2.f32 %v918_v18 }
 0x42d   : > { %v1255_v11 = vpop.eup %1254 }
 0x42e   : > { %v652_v20 = vmul.f32 %v1255_v11, %v1510_v45  ;;  %v1257_v23 = vpop.eup %1256 }
 0x42f   : > { %v920_v25 = vmul.f32 0.6931472, %v1257_v23 }
 0x430   : > { %v776_v21 = vmul.f32 %v768_v19, %v652_v20 }
 0x431   : > { %v921_v16 = vsel %vm373_vm14, %v920_v25, 0.0 }
 0x432   : > { %v790_v22 = vsel %vm360_vm3, %v776_v21, 0.0 }
 0x433   : > { %v791_v24 = vadd.f32 %v790_v22, %v789_v4 }
 0x435   : > { %792 = vadd.xlane.f32.xlu1 %v791_v24 }
 0x439   : > { %922 = vadd.xlane.f32.xlu1 %v921_v16 }
 0x4c2   : > { %v793_v26 = vpop.xlane.xlu1 %792 }
 0x4c3   : > { %v794_v45 = vrot.slane %v793_v26, 4 }
 0x4c5   : > { %v795_v28 = vadd.f32 %v794_v45, %v793_v26 }
 0x4c6   : > { %v923_v29 = vpop.xlane.xlu1 %922 }
 0x4c7   : > { %v796_v30 = vrot.slane %v795_v28, 2  ;;  %v924_v31 = vrot.slane %v923_v29, 4 }
 0x4c9   : > { %v925_v32 = vadd.f32 %v924_v31, %v923_v29  ;;  %v797_v33 = vadd.f32 %v796_v30, %v795_v28 }
 0x4cb   : > { %v926_v34 = vrot.slane %v925_v32, 2  ;;  %v798_v35 = vrot.slane %v797_v33, 1 }
 0x4cd   : > { %v927_v36 = vadd.f32 %v926_v34, %v925_v32  ;;  %v799_v37 = vadd.f32 %v798_v35, %v797_v33 }
 0x4cf   : > { %1149 = vpush %v799_v37  ;;  %v928_v38 = vrot.slane %v927_v36, 1 }
 0x4d1   : > { %v929_v39 = vadd.f32 %v928_v38, %v927_v36 }
 0x4d3   : > { %1151 = vpush %v929_v39 }
 0x500   : > { %s1150_s30 = spop %1149 }
 0x501   : > { %s801_s4 = ssub.f32 0.0, %s1150_s30 }
 0x503   : > { %v936_v40 = vstv %s801_s4 }
 0x504   : > { %s1152_s5 = spop %1151 }
 0x505   : > { %s931_s6 = ssub.f32 0.0, %s1152_s5 }
 0x507   : > { %v935_v41 = vstv %s931_s6 }
 0x508   : > { %v937_v42 = vsel %vm934_vm0, %v935_v41, %v936_v40 }
 0x509   : > { %v938_v56 = vadd.f32 %v937_v42, %v933_v27 }
 0x50b   : > { %940 = vst.msk [vmem:[%s214_s29] sm:$0x1] %vm375_vm15, %v938_v56 }
 0x50c PF: > { %s14_s14 = sadd.s32 1, %s1280_s14   ;;  %s1556_s12 = smov %s1276_s13 }
 0x50d   : > { %p11_p5 = scmp.ge.s32.totalorder %s14_s14, 4   ;;  %s1557_s13 = smov %s1559_s15 }
 0x50f   :  { %13 = sbr.rel (!%p11_p5) target bundleno = 2 (0x2), region = 77 }

</bundles_post_ra>
